<compile_context>
chip_gen: v7x
topology: tpu7x:2x2x1
jax: 0.10.0
libtpu: 0.0.40
codegen_flags: <defaults>
</compile_context>

<pallas_src>
import functools

import jax
import jax.numpy as jnp
from jax.experimental import pallas as pl
from jax.experimental.pallas import tpu as pltpu


# ------------------------------- the kernel --------------------------------

def _planar_step_kernel(zk_ref, u_ref, w_ref, b_ref, z_ref, logdet_ref, *, red_axis):
    """red_axis = 0: tiles are (D, TB) (batch on lanes); red_axis = 1: (TB, D)."""
    zk = zk_ref[...]
    u = u_ref[...]
    w = w_ref[...]
    b = b_ref[...]

    # uw = w . u  (per batch element)
    uw = jnp.sum(w * u, axis=red_axis, keepdims=True)
    m_uw = -1.0 + jax.nn.softplus(uw)
    w_norm_sq = jnp.sum(w * w, axis=red_axis, keepdims=True)
    inv_norm = pl.reciprocal(w_norm_sq, approx=False)

    # u_hat enforces the invertibility condition
    u_hat = u + ((m_uw - uw) * inv_norm) * w

    # wzb = w . z + b
    wzb = jnp.sum(w * zk, axis=red_axis, keepdims=True) + b
    h = jnp.tanh(wzb)

    # z' = z + u_hat * tanh(wzb)
    z_ref[...] = zk + u_hat * h

    # Exact identity: w . u_hat = uw + (m_uw - uw) * ||w||^2 / ||w||^2 = m_uw,
    # so the explicit (D,·) multiply + cross-lane reduction is unnecessary.
    psi_u = m_uw * (1.0 - h * h)
    logdet_ref[...] = jnp.log(jnp.abs(1.0 + psi_u))


# ------------------------------- host wrapper -------------------------------

def _round_up(x, m):
    return ((x + m - 1) // m) * m


@functools.partial(jax.jit, static_argnames=("block", "vmem_budget_bytes"))
def planar_step(zk, u, w, b, *, block=None, vmem_budget_bytes=20 << 20):
    """PlanarStep.forward.

    zk: (B, D), u: (B, D, 1), w: (B, 1, D), b: (B, 1, 1)
    returns (z: (B, D), logdet: (B,))
    """
    B, D = zk.shape
    dtype = zk.dtype
    itemsize = jnp.dtype(dtype).itemsize

    u2 = u.reshape(B, D)
    w2 = w.reshape(B, D)
    b1 = b.reshape(B)

    compiler_params = pltpu.CompilerParams(
        dimension_semantics=("parallel",),   # shard batch tiles across v7x's 2 TCs
        vmem_limit_bytes=32 << 20,           # > v5e's 16 MiB default scoped limit
    )

    if D < 128:
        # ---- batch-on-lanes layout: (D, B_pad) slabs, lane-dense for small D ----
        # Double-buffered working set per lane-column:
        #   2 bufs * (zk,u,w,z blocks of height D  +  b,logdet blocks of height 1)
        per_lane = 2 * (4 * D + 2) * itemsize
        if block is None:
            cap = max(128, (vmem_budget_bytes // per_lane) // 128 * 128)
            block = min(cap, _round_up(B, 128))
        B_pad = _round_up(B, block)
        grid_len = B_pad // block
        if grid_len == 1 and block >= 256:
            # never leave one TensorCore idle when there is enough batch to split
            block = (block // 2) // 128 * 128
            B_pad = _round_up(B, block)
            grid_len = B_pad // block
        pad = B_pad - B

        zk_t = jnp.pad(zk, ((0, pad), (0, 0))).T                          # (D, B_pad)
        u_t = jnp.pad(u2, ((0, pad), (0, 0))).T                           # (D, B_pad)
        w_t = jnp.pad(w2, ((0, pad), (0, 0)), constant_values=1.0).T      # (D, B_pad)
        b_t = jnp.pad(b1, (0, pad)).reshape(1, B_pad)                     # (1, B_pad)

        spec_db = pl.BlockSpec((D, block), lambda i: (0, i))
        spec_1b = pl.BlockSpec((1, block), lambda i: (0, i))

        cost = pl.CostEstimate(
            flops=9 * B_pad * D + 24 * B_pad,
            transcendentals=5 * B_pad,
            bytes_accessed=itemsize * (4 * B_pad * D + 2 * B_pad),
        )

        z_t, logdet_t = pl.pallas_call(
            functools.partial(_planar_step_kernel, red_axis=0),
            out_shape=(jax.ShapeDtypeStruct((D, B_pad), dtype),
                       jax.ShapeDtypeStruct((1, B_pad), dtype)),
            grid=(grid_len,),
            in_specs=[spec_db, spec_db, spec_db, spec_1b],
            out_specs=(spec_db, spec_1b),
            compiler_params=compiler_params,
            cost_estimate=cost,
        )(zk_t, u_t, w_t, b_t)

        z = z_t[:, :B].T
        logdet = logdet_t[0, :B]

    else:
        # ---- feature dim already lane-dense: batch on sublanes, big row tiles ----
        per_row = 2 * (4 * D + 2) * itemsize
        if block is None:
            cap = max(8, (vmem_budget_bytes // per_row) // 8 * 8)
            block = min(cap, _round_up(B, 8))
        B_pad = _round_up(B, block)
        grid_len = B_pad // block
        if grid_len == 1 and block >= 16:
            block = (block // 2) // 8 * 8
            B_pad = _round_up(B, block)
            grid_len = B_pad // block
        pad = B_pad - B

        zk_p = jnp.pad(zk, ((0, pad), (0, 0)))
        u_p = jnp.pad(u2, ((0, pad), (0, 0)))
        w_p = jnp.pad(w2, ((0, pad), (0, 0)), constant_values=1.0)
        b_p = jnp.pad(b1, (0, pad)).reshape(B_pad, 1)

        spec_bd = pl.BlockSpec((block, D), lambda i: (i, 0))
        spec_b1 = pl.BlockSpec((block, 1), lambda i: (i, 0))

        cost = pl.CostEstimate(
            flops=9 * B_pad * D + 24 * B_pad,
            transcendentals=5 * B_pad,
            bytes_accessed=itemsize * (4 * B_pad * D + 2 * B_pad),
        )

        z_p, logdet_p = pl.pallas_call(
            functools.partial(_planar_step_kernel, red_axis=1),
            out_shape=(jax.ShapeDtypeStruct((B_pad, D), dtype),
                       jax.ShapeDtypeStruct((B_pad, 1), dtype)),
            grid=(grid_len,),
            in_specs=[spec_bd, spec_bd, spec_bd, spec_b1],
            out_specs=(spec_bd, spec_b1),
            compiler_params=compiler_params,
            cost_estimate=cost,
        )(zk_p, u_p, w_p, b_p)

        z = z_p[:B]
        logdet = logdet_p[:B, 0]

    return z, logdet


# ------------------------------ pure-JAX reference ---------------------------

def reference(zk, u, w, b):
    """Direct transcription of the PyTorch PlanarStep.forward."""
    zk3 = zk[:, :, None]                                     # (B, D, 1)
    uw = jnp.matmul(w, u)                                    # (B, 1, 1)
    m_uw = -1.0 + jax.nn.softplus(uw)
    w_norm_sq = jnp.sum(w ** 2, axis=2, keepdims=True)       # (B, 1, 1)
    u_hat = u + (m_uw - uw) * jnp.swapaxes(w, 2, 1) / w_norm_sq
    wzb = jnp.matmul(w, zk3) + b                             # (B, 1, 1)
    z = zk3 + u_hat * jnp.tanh(wzb)
    z = z[:, :, 0]
    psi = w * (1.0 - jnp.tanh(wzb) ** 2)                     # (B, 1, D)
    logdet = jnp.log(jnp.abs(1.0 + jnp.matmul(psi, u_hat)))  # (B, 1, 1)
    return z, logdet[:, 0, 0]


# ----------------------------------- main ------------------------------------

if __name__ == "__main__":
    key = jax.random.PRNGKey(0)

    # Case 1: typical planar-flow size (small z_dim -> batch-on-lanes layout).
    B, z_dim = 16, 8
    kz, ku, kw, kb = jax.random.split(key, 4)
    zk = jax.random.normal(kz, (B, z_dim), dtype=jnp.float32)
    u = jax.random.normal(ku, (B, z_dim, 1), dtype=jnp.float32)
    w = jax.random.normal(kw, (B, 1, z_dim), dtype=jnp.float32)
    b = jax.random.normal(kb, (B, 1, 1), dtype=jnp.float32)

    z, logdet = planar_step(zk, u, w, b)
    jax.block_until_ready((z, logdet))

    z_ref, logdet_ref = reference(zk, u, w, b)
    assert z.shape == (B, z_dim) and logdet.shape == (B,)
    assert jnp.allclose(z, z_ref, atol=1e-5, rtol=1e-5), "z mismatch (small D)"
    assert jnp.allclose(logdet, logdet_ref, atol=1e-5, rtol=1e-5), "logdet mismatch (small D)"

    # Case 2: wide feature dim (D >= 128 -> batch-on-sublanes layout).
    B2, z_dim2 = 8, 256
    keys = jax.random.split(key, 8)
    zk2 = jax.random.normal(keys[4], (B2, z_dim2), dtype=jnp.float32)
    u2_ = jax.random.normal(keys[5], (B2, z_dim2, 1), dtype=jnp.float32)
    w2_ = jax.random.normal(keys[6], (B2, 1, z_dim2), dtype=jnp.float32)
    b2_ = jax.random.normal(keys[7], (B2, 1, 1), dtype=jnp.float32)

    z2, logdet2 = planar_step(zk2, u2_, w2_, b2_)
    jax.block_until_ready((z2, logdet2))

    z2_ref, logdet2_ref = reference(zk2, u2_, w2_, b2_)
    assert z2.shape == (B2, z_dim2) and logdet2.shape == (B2,)
    assert jnp.allclose(z2, z2_ref, atol=1e-4, rtol=1e-5), "z mismatch (large D)"
    assert jnp.allclose(logdet2, logdet2_ref, atol=1e-4, rtol=1e-5), "logdet mismatch (large D)"

    print("KERNEL_OK")
</pallas_src>

<mosaic_0001>
module attributes {stable_mosaic.version = 11 : i64} {
  func.func @_planar_step_kernel(%arg0: i32, %arg1: memref<8x128xf32, #tpu.memory_space<vmem>>, %arg2: memref<8x128xf32, #tpu.memory_space<vmem>>, %arg3: memref<8x128xf32, #tpu.memory_space<vmem>>, %arg4: memref<1x128xf32, #tpu.memory_space<vmem>>, %arg5: memref<8x128xf32, #tpu.memory_space<vmem>>, %arg6: memref<1x128xf32, #tpu.memory_space<vmem>>) attributes {dimension_semantics = [#tpu.dimension_semantics<parallel>], iteration_bounds = array<i64: 1>, scalar_prefetch = 0 : i64, scratch_operands = 0 : i64, tpu.core_type = #tpu.core_type<tc>, window_params = [{transform_indices = @transform_0, window_bounds = array<i64: 8, 128>}, {transform_indices = @transform_1, window_bounds = array<i64: 8, 128>}, {transform_indices = @transform_2, window_bounds = array<i64: 8, 128>}, {transform_indices = @transform_3, window_bounds = array<i64: 1, 128>}, {transform_indices = @transform_4, window_bounds = array<i64: 8, 128>}, {transform_indices = @transform_5, window_bounds = array<i64: 1, 128>}]} {
    %c0 = arith.constant 0 : index
    %c0_0 = arith.constant 0 : index
    %0 = vector.load %arg1[%c0, %c0_0] : memref<8x128xf32, #tpu.memory_space<vmem>>, vector<8x128xf32>
    %c0_1 = arith.constant 0 : index
    %c0_2 = arith.constant 0 : index
    %1 = vector.load %arg2[%c0_1, %c0_2] : memref<8x128xf32, #tpu.memory_space<vmem>>, vector<8x128xf32>
    %c0_3 = arith.constant 0 : index
    %c0_4 = arith.constant 0 : index
    %2 = vector.load %arg3[%c0_3, %c0_4] : memref<8x128xf32, #tpu.memory_space<vmem>>, vector<8x128xf32>
    %c0_5 = arith.constant 0 : index
    %c0_6 = arith.constant 0 : index
    %3 = vector.load %arg4[%c0_5, %c0_6] : memref<1x128xf32, #tpu.memory_space<vmem>>, vector<1x128xf32>
    %4 = arith.mulf %2, %1 : vector<8x128xf32>
    %cst = arith.constant dense<0.000000e+00> : vector<128xf32>
    %5 = vector.multi_reduction <add>, %4, %cst [0] : vector<8x128xf32> to vector<128xf32>
    %6 = vector.shape_cast %5 : vector<128xf32> to vector<1x128xf32>
    %cst_7 = arith.constant 0.000000e+00 : f32
    %7 = vector.broadcast %cst_7 : f32 to vector<1x128xf32>
    %8 = arith.maximumf %6, %7 : vector<1x128xf32>
    %9 = vector.broadcast %cst_7 : f32 to vector<1x128xf32>
    %10 = arith.subf %6, %9 : vector<1x128xf32>
    %11 = arith.cmpf one, %10, %10 : vector<1x128xf32>
    %12 = vector.broadcast %cst_7 : f32 to vector<1x128xf32>
    %13 = arith.addf %6, %12 : vector<1x128xf32>
    %14 = math.absf %10 : vector<1x128xf32>
    %cst_8 = arith.constant 0.000000e+00 : f32
    %15 = vector.broadcast %cst_8 : f32 to vector<1x128xf32>
    %16 = arith.subf %15, %14 : vector<1x128xf32>
    %17 = math.exp %16 : vector<1x128xf32>
    %18 = math.log1p %17 : vector<1x128xf32>
    %19 = arith.addf %8, %18 : vector<1x128xf32>
    %20 = arith.select %11, %13, %19 : vector<1x128xi1>, vector<1x128xf32>
    %cst_9 = arith.constant -1.000000e+00 : f32
    %21 = vector.broadcast %cst_9 : f32 to vector<1x128xf32>
    %22 = arith.addf %21, %20 : vector<1x128xf32>
    %23 = arith.mulf %2, %2 : vector<8x128xf32>
    %cst_10 = arith.constant dense<0.000000e+00> : vector<128xf32>
    %24 = vector.multi_reduction <add>, %23, %cst_10 [0] : vector<8x128xf32> to vector<128xf32>
    %25 = vector.shape_cast %24 : vector<128xf32> to vector<1x128xf32>
    %26 = tpu.reciprocal %25 : vector<1x128xf32> -> vector<1x128xf32>
    %27 = arith.subf %22, %6 : vector<1x128xf32>
    %28 = arith.mulf %27, %26 : vector<1x128xf32>
    %29 = vector.broadcast %28 : vector<1x128xf32> to vector<8x128xf32>
    %30 = arith.mulf %29, %2 : vector<8x128xf32>
    %31 = arith.addf %1, %30 : vector<8x128xf32>
    %32 = arith.mulf %2, %0 : vector<8x128xf32>
    %cst_11 = arith.constant dense<0.000000e+00> : vector<128xf32>
    %33 = vector.multi_reduction <add>, %32, %cst_11 [0] : vector<8x128xf32> to vector<128xf32>
    %34 = vector.shape_cast %33 : vector<128xf32> to vector<1x128xf32>
    %35 = arith.addf %34, %3 : vector<1x128xf32>
    %36 = math.tanh %35 : vector<1x128xf32>
    %37 = vector.broadcast %36 : vector<1x128xf32> to vector<8x128xf32>
    %38 = arith.mulf %31, %37 : vector<8x128xf32>
    %39 = arith.addf %0, %38 : vector<8x128xf32>
    %c0_12 = arith.constant 0 : index
    %c0_13 = arith.constant 0 : index
    %40 = vector.load %arg5[%c0_12, %c0_13] : memref<8x128xf32, #tpu.memory_space<vmem>>, vector<8x128xf32>
    tpu.vector_store %arg5[%c0_12, %c0_13], %39 {strides = array<i32>} : memref<8x128xf32, #tpu.memory_space<vmem>>, vector<8x128xf32>,
    %41 = arith.mulf %36, %36 : vector<1x128xf32>
    %cst_14 = arith.constant 1.000000e+00 : f32
    %42 = vector.broadcast %cst_14 : f32 to vector<1x128xf32>
    %43 = arith.subf %42, %41 : vector<1x128xf32>
    %44 = arith.mulf %22, %43 : vector<1x128xf32>
    %cst_15 = arith.constant 1.000000e+00 : f32
    %45 = vector.broadcast %cst_15 : f32 to vector<1x128xf32>
    %46 = arith.addf %45, %44 : vector<1x128xf32>
    %47 = math.absf %46 : vector<1x128xf32>
    %48 = math.log %47 : vector<1x128xf32>
    %c0_16 = arith.constant 0 : index
    %c0_17 = arith.constant 0 : index
    %49 = vector.load %arg6[%c0_16, %c0_17] : memref<1x128xf32, #tpu.memory_space<vmem>>, vector<1x128xf32>
    tpu.vector_store %arg6[%c0_16, %c0_17], %48 {strides = array<i32>} : memref<1x128xf32, #tpu.memory_space<vmem>>, vector<1x128xf32>,
    return
  }
  func.func @transform_0(%arg0: i32) -> (i32, i32) {
    %c0_i32 = arith.constant 0 : i32
    %c0_i32_0 = arith.constant 0 : i32
    return %c0_i32, %arg0 : i32, i32
  }
  func.func @transform_1(%arg0: i32) -> (i32, i32) {
    %c0_i32 = arith.constant 0 : i32
    %c0_i32_0 = arith.constant 0 : i32
    return %c0_i32, %arg0 : i32, i32
  }
  func.func @transform_2(%arg0: i32) -> (i32, i32) {
    %c0_i32 = arith.constant 0 : i32
    %c0_i32_0 = arith.constant 0 : i32
    return %c0_i32, %arg0 : i32, i32
  }
  func.func @transform_3(%arg0: i32) -> (i32, i32) {
    %c0_i32 = arith.constant 0 : i32
    %c0_i32_0 = arith.constant 0 : i32
    return %c0_i32, %arg0 : i32, i32
  }
  func.func @transform_4(%arg0: i32) -> (i32, i32) {
    %c0_i32 = arith.constant 0 : i32
    %c0_i32_0 = arith.constant 0 : i32
    return %c0_i32, %arg0 : i32, i32
  }
  func.func @transform_5(%arg0: i32) -> (i32, i32) {
    %c0_i32 = arith.constant 0 : i32
    %c0_i32_0 = arith.constant 0 : i32
    return %c0_i32, %arg0 : i32, i32
  }
}

</mosaic_0001>

<bundles_post_ra>
// kernel: planar_step.1
= control target key start
LH: loop header
LB: loop body
LE: loop exit
PB: predicated region body
PF: predicated region fallthrough
CT: control target
= control target key end

     0   :  { %v70_v39 = vlaneseq  ;;  %s155_s0 = inlined_call_operand.vmem [shape: f32[8,128], index: 0, kind: input, shape index: {}]   ;;  %s156_s1 = inlined_call_operand.vmem [shape: f32[8,128], index: 1, kind: input, shape index: {}]   ;;  %s157_s2 = inlined_call_operand.vmem [shape: f32[8,128], index: 2, kind: input, shape index: {}]   ;;  %s158_s3 = inlined_call_operand.vmem [shape: f32[1,128], index: 3, kind: input, shape index: {}]   ;;  %s159_s4 = inlined_call_operand.vmem [shape: f32[8,128], index: 4, kind: output, shape index: {0}]   ;;  %s160_s5 = inlined_call_operand.vmem [shape: f32[1,128], index: 5, kind: output, shape index: {1}]  }
   0x1   :  { %v136_v0 = vld [vmem:[%s155_s0] sm:$0xff] }
   0x2   :  { %v20_v1 = vld [vmem:[%s156_s1] sm:$0xff]  ;;  %v71_v43 = vshrl.u32 %v70_v39, 7 }
   0x3   :  { %v21_v2 = vld [vmem:[%s157_s2] sm:$0xff] }
   0x4   :  { %v23_v3 = vmul.f32 %v21_v2, %v20_v1  ;;  %v61_v4 = vmul.f32 %v21_v2, %v136_v0  ;;  %v49_v14 = vmul.f32 %v21_v2, %v21_v2  ;;  %v22_v23 = vld [vmem:[%s158_s3] sm:$0x1]  ;;  %v72_v49 = vsub.s32 0, %v71_v43 }
   0x6   :  { %v24_v5 = vrot.slane %v23_v3, 4  ;;  %v62_v6 = vrot.slane %v61_v4, 4  ;;  %v50_v18 = vrot.slane %v49_v14, 4 }
   0x8   :  { %v25_v7 = vadd.f32 %v24_v5, %v23_v3  ;;  %v63_v9 = vadd.f32 %v62_v6, %v61_v4  ;;  %v51_v21 = vadd.f32 %v50_v18, %v49_v14 }
   0xa   :  { %v26_v8 = vrot.slane %v25_v7, 2  ;;  %v64_v12 = vrot.slane %v63_v9, 2  ;;  %v52_v24 = vrot.slane %v51_v21, 2 }
   0xc   :  { %v27_v10 = vadd.f32 %v26_v8, %v25_v7  ;;  %v65_v16 = vadd.f32 %v64_v12, %v63_v9  ;;  %v53_v26 = vadd.f32 %v52_v24, %v51_v21 }
   0xe   :  { %v28_v11 = vrot.slane %v27_v10, 1  ;;  %v66_v20 = vrot.slane %v65_v16, 1  ;;  %v54_v29 = vrot.slane %v53_v26, 1 }
  0x10   :  { %v29_v13 = vadd.f32 %v28_v11, %v27_v10  ;;  %v67_v22 = vadd.f32 %v66_v20, %v65_v16  ;;  %v55_v31 = vadd.f32 %v54_v29, %v53_v26 }
  0x12   :  { %v33_v15 = vand.u32 2147483647, %v29_v13  ;;  %v68_v25 = vadd.f32 %v67_v22, %v22_v23  ;;  %v30_v37 = vmax.f32 %v29_v13, 0.0  ;;  %vm31_vm1 = vcmp.ne.f32.partialorder %v29_v13, %v29_v13 }
  0x14   :  { %v34_v17 = vsub.f32 0.0, %v33_v15 }
  0x16   :  { %v35_v19 = vmul.f32 1.442695, %v34_v17 }
  0x18   :  { %93 = vpow2.f32 %v35_v19 }
  0x19   :  { %95 = vtanh.f32 %v68_v25 }
  0x22   :  { %v94_v27 = vpop.eup %93 }
  0x23   :  { %v37_v28 = vadd.f32 1.0, %v94_v27  ;;  %v40_v30 = vmul.f32 -0.5, %v94_v27  ;;  %v43_v33 = vand.u32 2147483647, %v94_v27  ;;  %v96_v34 = vpop.eup %95 }
  0x24   :  { %v77_v40 = vmul.f32 %v96_v34, %v96_v34  ;;  %v73_v54 = vrot.slane %v96_v34, %v72_v49 }
  0x25   :  { %97 = vlog2.f32 %v37_v28  ;;  %v41_v32 = vadd.f32 1.0, %v40_v30  ;;  %vm44_vm0 = vcmp.lt.f32.partialorder %v43_v33, 0.0004427343 }
  0x26   :  { %99 = vrcp.f32 %v55_v31  ;;  %v78_v44 = vsub.f32 1.0, %v77_v40 }
  0x27   :  { %v42_v35 = vmul.f32 %v94_v27, %v41_v32 }
  0x2f   :  { %v98_v36 = vpop.eup %97 }
  0x30   :  { %v39_v38 = vmul.f32 0.6931472, %v98_v36  ;;  %v100_v47 = vpop.eup %99 }
  0x32   :  { %v45_v41 = vsel %vm44_vm0, %v42_v35, %v39_v38 }
  0x33   :  { %v46_v42 = vadd.f32 %v45_v41, %v30_v37 }
  0x35   :  { %v47_v45 = vsel %vm31_vm1, %v29_v13, %v46_v42 }
  0x36   :  { %v48_v46 = vadd.f32 -1.0, %v47_v45 }
  0x38   :  { %v57_v48 = vsub.f32 %v48_v46, %v29_v13  ;;  %v79_v50 = vmul.f32 %v78_v44, %v48_v46 }
  0x3a   :  { %v58_v51 = vmul.f32 %v100_v47, %v57_v48  ;;  %v80_v52 = vadd.f32 1.0, %v79_v50 }
  0x3c   :  { %v59_v53 = vmul.f32 %v58_v51, %v21_v2  ;;  %v81_v55 = vand.u32 2147483647, %v80_v52 }
  0x3e   :  { %v60_v56 = vadd.f32 %v59_v53, %v20_v1  ;;  %101 = vlog2.f32 %v81_v55 }
  0x40   :  { %v74_v57 = vmul.f32 %v73_v54, %v60_v56 }
  0x42   :  { %v75_v58 = vadd.f32 %v74_v57, %v136_v0 }
  0x44   :  { %76 = vst [vmem:[%s159_s4] sm:$0xff] %v75_v58 }
  0x48   :  { %v102_v59 = vpop.eup %101 }
  0x49   :  { %v83_v60 = vmul.f32 0.6931472, %v102_v59 }
  0x4b   :  { %84 = vst [vmem:[%s160_s5] sm:$0x1] %v83_v60 }

</bundles_post_ra>
